<compile_context>
chip_gen: v6e
topology: v6e:2x2x1
jax: 0.10.0
libtpu: 0.0.40
codegen_flags: <defaults>
</compile_context>

<pallas_src>
import functools
import math

import jax
import jax.numpy as jnp
from jax import lax
from jax.experimental import pallas as pl
from jax.experimental.pallas import tpu as pltpu


# ------------------------------ tile helpers ------------------------------

def _round_up(x, m):
    return ((x + m - 1) // m) * m


def _pick_tile(dim, preferred, granularity):
    """Largest multiple of `granularity` that divides `dim` and is <= preferred.

    Falls back to the full dimension (always a legal block) when `dim` is small
    or not divisible by the granularity.
    """
    if dim <= preferred:
        return dim
    if dim % granularity != 0:
        # TODO(synk): pad awkward K/N model dims instead of a full-dim block;
        # SAM2 dims (96/192/384/768/1152) never hit this path.
        return dim
    t = (preferred // granularity) * granularity
    while t >= granularity:
        if dim % t == 0:
            return t
        t -= granularity
    return dim


def _pad_rows(x, tm):
    """Zero-pad the row (M) dim up to a multiple of the chosen row tile."""
    m = x.shape[0]
    mp = _round_up(m, tm)
    if mp != m:
        x = jnp.pad(x, ((0, mp - m), (0, 0)))
    return x, m, mp


# ------------------------ fused qkv projection kernel ------------------------

def _qkv_kernel(x_ref, w_ref, b_ref, q_ref, k_ref, v_ref, acc_ref):
    kk = pl.program_id(1)

    @pl.when(kk == 0)
    def _init():
        acc_ref[...] = jnp.zeros_like(acc_ref)

    x = x_ref[...]
    if x.dtype != w_ref.dtype:          # static check; only the f32 input is cast
        x = x.astype(w_ref.dtype)
    acc_ref[...] += jnp.dot(x, w_ref[...], preferred_element_type=jnp.float32)

    @pl.when(kk == pl.num_programs(1) - 1)
    def _finalize():
        y = acc_ref[...] + b_ref[...]                      # f32 bias add
        n = q_ref.shape[-1]                                # dim_out
        q_ref[...] = y[:, 0 * n:1 * n].astype(q_ref.dtype)
        k_ref[...] = y[:, 1 * n:2 * n].astype(k_ref.dtype)
        v_ref[...] = y[:, 2 * n:3 * n].astype(v_ref.dtype)


def qkv_proj_pallas(x, w, b, dim_out, out_dtype, tm_pref=256, tk_pref=512):
    """(q, k, v) = split(x @ w + b, 3, axis=-1) as a single fused pallas_call."""
    M, K = x.shape
    assert w.shape == (K, 3 * dim_out)
    tm = min(tm_pref, _round_up(M, 16))      # 16-row granularity (bf16 packing)
    x, M, Mp = _pad_rows(x, tm)
    tk = _pick_tile(K, tk_pref, 128)
    grid = (Mp // tm, K // tk)

    cost = pl.CostEstimate(
        flops=2 * Mp * K * 3 * dim_out,
        transcendentals=0,
        bytes_accessed=(Mp * K * x.dtype.itemsize
                        + K * 3 * dim_out * w.dtype.itemsize
                        + 3 * Mp * dim_out * jnp.dtype(out_dtype).itemsize),
    )
    outs = pl.pallas_call(
        _qkv_kernel,
        out_shape=tuple(jax.ShapeDtypeStruct((Mp, dim_out), out_dtype)
                        for _ in range(3)),
        grid=grid,
        in_specs=[
            pl.BlockSpec((tm, tk), lambda i, kk: (i, kk)),
            pl.BlockSpec((tk, 3 * dim_out), lambda i, kk: (kk, 0)),
            pl.BlockSpec((1, 3 * dim_out), lambda i, kk: (0, 0)),
        ],
        out_specs=tuple(pl.BlockSpec((tm, dim_out), lambda i, kk: (i, 0))
                        for _ in range(3)),
        scratch_shapes=[pltpu.VMEM((tm, 3 * dim_out), jnp.float32)],
        compiler_params=pltpu.CompilerParams(
            dimension_semantics=("parallel", "arbitrary")),
        cost_estimate=cost,
    )(x, w, b.reshape(1, 3 * dim_out))
    q, k, v = outs
    if Mp != M:
        q, k, v = q[:M], k[:M], v[:M]
    return q, k, v


# ----------------------------- tiled linear (proj) ---------------------------

def _linear_kernel(x_ref, w_ref, b_ref, o_ref, acc_ref):
    kk = pl.program_id(2)

    @pl.when(kk == 0)
    def _init():
        acc_ref[...] = jnp.zeros_like(acc_ref)

    x = x_ref[...]
    if x.dtype != w_ref.dtype:          # static; weights already in compute dtype
        x = x.astype(w_ref.dtype)
    acc_ref[...] += jnp.dot(x, w_ref[...], preferred_element_type=jnp.float32)

    @pl.when(kk == pl.num_programs(2) - 1)
    def _finalize():
        o_ref[...] = (acc_ref[...] + b_ref[...]).astype(o_ref.dtype)


def linear_pallas(x, w, b, out_dtype=None, tm_pref=512, tn_pref=512, tk_pref=512):
    """y = x @ w + b with a tiled, K-pipelined Pallas matmul (f32 accumulator)."""
    M, K = x.shape
    N = w.shape[1]
    out_dtype = x.dtype if out_dtype is None else out_dtype
    tm = min(tm_pref, _round_up(M, 16))
    x, M, Mp = _pad_rows(x, tm)
    tn = _pick_tile(N, tn_pref, 128)
    tk = _pick_tile(K, tk_pref, 128)
    grid = (Mp // tm, N // tn, K // tk)

    cost = pl.CostEstimate(
        flops=2 * Mp * K * N,
        transcendentals=0,
        bytes_accessed=(Mp * K * x.dtype.itemsize + K * N * w.dtype.itemsize
                        + Mp * N * jnp.dtype(out_dtype).itemsize),
    )
    out = pl.pallas_call(
        _linear_kernel,
        out_shape=jax.ShapeDtypeStruct((Mp, N), out_dtype),
        grid=grid,
        in_specs=[
            pl.BlockSpec((tm, tk), lambda i, j, kk: (i, kk)),
            pl.BlockSpec((tk, tn), lambda i, j, kk: (kk, j)),
            pl.BlockSpec((1, tn), lambda i, j, kk: (0, j)),
        ],
        out_specs=pl.BlockSpec((tm, tn), lambda i, j, kk: (i, j)),
        scratch_shapes=[pltpu.VMEM((tm, tn), jnp.float32)],
        compiler_params=pltpu.CompilerParams(
            dimension_semantics=("parallel", "parallel", "arbitrary")),
        cost_estimate=cost,
    )(x, w, b.reshape(1, N))
    return out[:M] if Mp != M else out


# ------------------------- flash-style attention ---------------------------

def _attention_kernel(num_heads, head_dim, q_ref, k_ref, v_ref, o_ref,
                      m_ref, l_ref, acc_ref):
    """One (q_tile, batch) block accumulating over kv tiles (online softmax).

    q/k/v blocks are (1, tile, num_heads*head_dim) bf16; heads are split with
    static lane slices in-kernel (no XLA transposes). Softmax scale is already
    folded into the q projection weights.
    """
    ki = pl.program_id(2)

    @pl.when(ki == 0)
    def _init():
        m_ref[...] = jnp.full_like(m_ref, -jnp.inf)
        l_ref[...] = jnp.zeros_like(l_ref)
        acc_ref[...] = jnp.zeros_like(acc_ref)

    # TODO(synk): with head_dim < 128 the per-head matmuls underfeed the
    # 256-wide MXU on v6e/v7x; a head-major restructure (extra grid axis over
    # heads) would lift that ceiling at the cost of an extra relayout.
    for h in range(num_heads):          # static unroll; num_heads is small
        sl = slice(h * head_dim, (h + 1) * head_dim)
        q = q_ref[0, :, sl]
        k = k_ref[0, :, sl]
        # Contract last dims directly (no transpose of k).
        s = lax.dot_general(q, k, (((1,), (1,)), ((), ())),
                            preferred_element_type=jnp.float32)      # (tq, tk)
        m_prev = m_ref[h]
        m_new = jnp.maximum(m_prev, jnp.max(s, axis=-1, keepdims=True))
        alpha = jnp.exp(m_prev - m_new)
        p = jnp.exp(s - m_new)
        l_ref[h] = alpha * l_ref[h] + jnp.sum(p, axis=-1, keepdims=True)
        v = v_ref[0, :, sl]
        pv = lax.dot_general(p.astype(v.dtype), v, (((1,), (0,)), ((), ())),
                             preferred_element_type=jnp.float32)     # (tq, hd)
        acc_ref[h] = alpha * acc_ref[h] + pv
        m_ref[h] = m_new

    @pl.when(ki == pl.num_programs(2) - 1)
    def _finalize():
        # Exact f32 reciprocal (finalize-only, negligible) and a single
        # lane-dense (tq, D) store instead of per-head masked stores.
        parts = [acc_ref[h] * (1.0 / l_ref[h]) for h in range(num_heads)]
        o_ref[0] = jnp.concatenate(parts, axis=-1).astype(o_ref.dtype)


def attention_pallas(q, k, v, num_heads, tq_pref=256, tk_pref=512):
    """softmax(q k^T) v per head; q already carries the softmax scale."""
    B, N, D = q.shape
    head_dim = D // num_heads
    tq = _pick_tile(N, tq_pref, 128)
    tk = _pick_tile(N, tk_pref, 128)
    # q-tile axis leads the grid so both v7x TensorCores get work at small B.
    grid = (N // tq, B, N // tk)

    cost = pl.CostEstimate(
        flops=4 * B * N * N * D,
        transcendentals=B * num_heads * N * N,
        bytes_accessed=4 * B * N * D * q.dtype.itemsize,
    )
    kernel = functools.partial(_attention_kernel, num_heads, head_dim)
    return pl.pallas_call(
        kernel,
        out_shape=jax.ShapeDtypeStruct((B, N, D), q.dtype),
        grid=grid,
        in_specs=[
            pl.BlockSpec((1, tq, D), lambda qi, b, ki: (b, qi, 0)),
            pl.BlockSpec((1, tk, D), lambda qi, b, ki: (b, ki, 0)),
            pl.BlockSpec((1, tk, D), lambda qi, b, ki: (b, ki, 0)),
        ],
        out_specs=pl.BlockSpec((1, tq, D), lambda qi, b, ki: (b, qi, 0)),
        scratch_shapes=[
            pltpu.VMEM((num_heads, tq, 1), jnp.float32),          # running max
            pltpu.VMEM((num_heads, tq, 1), jnp.float32),          # running sum
            pltpu.VMEM((num_heads, tq, head_dim), jnp.float32),   # accumulator
        ],
        compiler_params=pltpu.CompilerParams(
            dimension_semantics=("parallel", "parallel", "arbitrary")),
        cost_estimate=cost,
    )(q, k, v)


# --------------------------- Module-level wrapper ---------------------------

class MultiScaleAttentionPallas:
    """JAX/Pallas re-implementation of MultiScaleAttention (q_pool=None path)."""

    def __init__(self, dim, dim_out, num_heads, key, compute_dtype=jnp.bfloat16):
        self.dim = dim
        self.dim_out = dim_out
        self.num_heads = num_heads
        self.head_dim = dim_out // num_heads
        # forward calls scaled_dot_product_attention with scale=None, so the
        # effective scale is 1/sqrt(head_dim).
        self.scale = 1.0 / math.sqrt(self.head_dim)
        self.compute_dtype = compute_dtype   # bf16 MXU operands by default

        k1, k2, k3, k4 = jax.random.split(key, 4)
        # f32 "master" parameters (used by the reference); stored transposed
        # (in_features, out_features) so y = x @ W + b.
        self.qkv_w = (jax.random.normal(k1, (dim, 3 * dim_out), jnp.float32)
                      * (1.0 / math.sqrt(dim)))
        self.qkv_b = jax.random.normal(k2, (3 * dim_out,), jnp.float32) * 0.02
        self.proj_w = (jax.random.normal(k3, (dim_out, dim_out), jnp.float32)
                       * (1.0 / math.sqrt(dim_out)))
        self.proj_b = jax.random.normal(k4, (dim_out,), jnp.float32) * 0.02

        # Kernel-side parameters: softmax scale folded into the q slice of the
        # fused qkv weight/bias, weights pre-cast ONCE to the MXU compute dtype
        # (no per-tile casts in the kernels).  Biases stay f32 — they are added
        # to the f32 accumulator at finalize.
        wd = jnp.float32 if compute_dtype is None else compute_dtype
        qkv_w_scaled = self.qkv_w.at[:, :dim_out].multiply(self.scale)
        self.qkv_w_k = qkv_w_scaled.astype(wd)
        self.qkv_b_k = self.qkv_b.at[:dim_out].multiply(self.scale)
        self.proj_w_k = self.proj_w.astype(wd)
        self.proj_b_k = self.proj_b

        # TODO(synk): q_pool (optional nn.MaxPool2d downsampling of q) is not
        # implemented; only the default q_pool=None path is supported.

    def __call__(self, x):
        B, H, W, _ = x.shape
        N = H * W
        act_dtype = x.dtype if self.compute_dtype is None else self.compute_dtype

        x2d = x.reshape(B * N, self.dim)

        # ---- fused qkv projection: x read once, three bf16 outputs ----
        q, k, v = qkv_proj_pallas(x2d, self.qkv_w_k, self.qkv_b_k,
                                  self.dim_out, act_dtype)
        q = q.reshape(B, N, self.dim_out)
        k = k.reshape(B, N, self.dim_out)
        v = v.reshape(B, N, self.dim_out)

        # ---- flash-style attention (heads split in-kernel, scale pre-folded) ----
        o = attention_pallas(q, k, v, self.num_heads)

        # ---- output projection (back to the input dtype) ----
        out = linear_pallas(o.reshape(B * N, self.dim_out),
                            self.proj_w_k, self.proj_b_k, out_dtype=x.dtype)
        return out.reshape(B, H, W, self.dim_out)


# ------------------------------ Reference (JAX) ------------------------------

def reference_forward(mod, x):
    B, H, W, _ = x.shape
    N = H * W
    nh, hd = mod.num_heads, mod.head_dim
    qkv = x.reshape(B * N, mod.dim) @ mod.qkv_w + mod.qkv_b
    qkv = qkv.reshape(B, N, 3, nh, hd)
    q = jnp.transpose(qkv[:, :, 0], (0, 2, 1, 3))
    k = jnp.transpose(qkv[:, :, 1], (0, 2, 1, 3))
    v = jnp.transpose(qkv[:, :, 2], (0, 2, 1, 3))
    s = jnp.einsum("bhnd,bhmd->bhnm", q, k) * mod.scale
    p = jax.nn.softmax(s, axis=-1)
    o = jnp.einsum("bhnm,bhmd->bhnd", p, v)
    o = jnp.transpose(o, (0, 2, 1, 3)).reshape(B * N, mod.dim_out)
    out = o @ mod.proj_w + mod.proj_b
    return out.reshape(B, H, W, mod.dim_out)


# ----------------------------------- Main -----------------------------------

if __name__ == "__main__":
    key = jax.random.PRNGKey(0)
    k_x, k_p = jax.random.split(key)

    B, H, W = 2, 8, 8
    dim, dim_out, num_heads = 32, 32, 2

    x = jax.random.normal(k_x, (B, H, W, dim), jnp.float32)

    mod = MultiScaleAttentionPallas(dim, dim_out, num_heads, k_p)

    out = jax.block_until_ready(mod(x))
    ref = reference_forward(mod, x)

    assert out.shape == (B, H, W, dim_out)
    assert out.dtype == x.dtype
    # bf16 MXU operands + bf16 q/k/v/o intermediates -> looser tolerance vs the
    # pure-f32 reference (accumulation is f32 throughout).
    assert jnp.allclose(out.astype(jnp.float32), ref, atol=5e-2, rtol=5e-2), \
        "mismatch vs JAX reference"

    print("KERNEL_OK")
</pallas_src>

<mosaic_0001>
module attributes {stable_mosaic.version = 11 : i64} {
  func.func @_qkv_kernel(%arg0: i32, %arg1: i32, %arg2: memref<128x32xf32, #tpu.memory_space<vmem>>, %arg3: memref<32x96xbf16, #tpu.memory_space<vmem>>, %arg4: memref<1x96xf32, #tpu.memory_space<vmem>>, %arg5: memref<128x32xbf16, #tpu.memory_space<vmem>>, %arg6: memref<128x32xbf16, #tpu.memory_space<vmem>>, %arg7: memref<128x32xbf16, #tpu.memory_space<vmem>>, %arg8: memref<128x96xf32, #tpu.memory_space<vmem>>) attributes {dimension_semantics = [#tpu.dimension_semantics<parallel>, #tpu.dimension_semantics<arbitrary>], iteration_bounds = array<i64: 1, 1>, scalar_prefetch = 0 : i64, scratch_operands = 1 : i64, tpu.core_type = #tpu.core_type<tc>, window_params = [{transform_indices = @transform_0, window_bounds = array<i64: 128, 32>}, {transform_indices = @transform_1, window_bounds = array<i64: 32, 96>}, {pipeline_mode = #tpu.pipeline_mode<synchronous>, transform_indices = @transform_2, window_bounds = array<i64: 1, 96>}, {transform_indices = @transform_3, window_bounds = array<i64: 128, 32>}, {transform_indices = @transform_4, window_bounds = array<i64: 128, 32>}, {transform_indices = @transform_5, window_bounds = array<i64: 128, 32>}]} {
    %c0_i32 = arith.constant 0 : i32
    %0 = arith.cmpi eq, %arg1, %c0_i32 : i32
    %1 = arith.extui %0 : i1 to i32
    %c0_i32_0 = arith.constant 0 : i32
    %2 = arith.cmpi ne, %1, %c0_i32_0 : i32
    scf.if %2 {
      %cst_10 = arith.constant 0.000000e+00 : f32
      %13 = vector.broadcast %cst_10 : f32 to vector<128x96xf32>
      %c0_11 = arith.constant 0 : index
      %c0_12 = arith.constant 0 : index
      %14 = vector.load %arg8[%c0_11, %c0_12] : memref<128x96xf32, #tpu.memory_space<vmem>>, vector<128x96xf32>
      tpu.vector_store %arg8[%c0_11, %c0_12], %13 {strides = array<i32>} : memref<128x96xf32, #tpu.memory_space<vmem>>, vector<128x96xf32>,
    } else {
    }
    %c0 = arith.constant 0 : index
    %c0_1 = arith.constant 0 : index
    %3 = vector.load %arg2[%c0, %c0_1] : memref<128x32xf32, #tpu.memory_space<vmem>>, vector<128x32xf32>
    %4 = arith.truncf %3 : vector<128x32xf32> to vector<128x32xbf16>
    %c0_2 = arith.constant 0 : index
    %c0_3 = arith.constant 0 : index
    %5 = vector.load %arg8[%c0_2, %c0_3] : memref<128x96xf32, #tpu.memory_space<vmem>>, vector<128x96xf32>
    %c0_4 = arith.constant 0 : index
    %c0_5 = arith.constant 0 : index
    %6 = vector.load %arg3[%c0_4, %c0_5] : memref<32x96xbf16, #tpu.memory_space<vmem>>, vector<32x96xbf16>
    %cst = arith.constant dense<0.000000e+00> : vector<128x96xf32>
    %7 = tpu.matmul %4, %6, %cst {dimension_numbers = #tpu.dot_dimension_numbers<[1], [0], [0], [1], [0, 0, 1, 1], [], []>} : vector<128x32xbf16>, vector<32x96xbf16>, vector<128x96xf32> -> vector<128x96xf32>
    %8 = arith.addf %5, %7 : vector<128x96xf32>
    %c0_6 = arith.constant 0 : index
    %c0_7 = arith.constant 0 : index
    %9 = vector.load %arg8[%c0_6, %c0_7] : memref<128x96xf32, #tpu.memory_space<vmem>>, vector<128x96xf32>
    tpu.vector_store %arg8[%c0_6, %c0_7], %8 {strides = array<i32>} : memref<128x96xf32, #tpu.memory_space<vmem>>, vector<128x96xf32>,
    %c0_i32_8 = arith.constant 0 : i32
    %10 = arith.cmpi eq, %arg1, %c0_i32_8 : i32
    %11 = arith.extui %10 : i1 to i32
    %c0_i32_9 = arith.constant 0 : i32
    %12 = arith.cmpi ne, %11, %c0_i32_9 : i32
    scf.if %12 {
      %c0_10 = arith.constant 0 : index
      %c0_11 = arith.constant 0 : index
      %13 = vector.load %arg8[%c0_10, %c0_11] : memref<128x96xf32, #tpu.memory_space<vmem>>, vector<128x96xf32>
      %c0_12 = arith.constant 0 : index
      %c0_13 = arith.constant 0 : index
      %14 = vector.load %arg4[%c0_12, %c0_13] : memref<1x96xf32, #tpu.memory_space<vmem>>, vector<1x96xf32>
      %15 = vector.broadcast %14 : vector<1x96xf32> to vector<128x96xf32>
      %16 = arith.addf %13, %15 : vector<128x96xf32>
      %17 = vector.extract_strided_slice %16 {offsets = [0, 0], sizes = [128, 32], strides = [1, 1]} : vector<128x96xf32> to vector<128x32xf32>
      %18 = arith.truncf %17 : vector<128x32xf32> to vector<128x32xbf16>
      %c0_14 = arith.constant 0 : index
      %c0_15 = arith.constant 0 : index
      %19 = vector.load %arg5[%c0_14, %c0_15] : memref<128x32xbf16, #tpu.memory_space<vmem>>, vector<128x32xbf16>
      tpu.vector_store %arg5[%c0_14, %c0_15], %18 {strides = array<i32>} : memref<128x32xbf16, #tpu.memory_space<vmem>>, vector<128x32xbf16>,
      %20 = vector.extract_strided_slice %16 {offsets = [0, 32], sizes = [128, 32], strides = [1, 1]} : vector<128x96xf32> to vector<128x32xf32>
      %21 = arith.truncf %20 : vector<128x32xf32> to vector<128x32xbf16>
      %c0_16 = arith.constant 0 : index
      %c0_17 = arith.constant 0 : index
      %22 = vector.load %arg6[%c0_16, %c0_17] : memref<128x32xbf16, #tpu.memory_space<vmem>>, vector<128x32xbf16>
      tpu.vector_store %arg6[%c0_16, %c0_17], %21 {strides = array<i32>} : memref<128x32xbf16, #tpu.memory_space<vmem>>, vector<128x32xbf16>,
      %23 = vector.extract_strided_slice %16 {offsets = [0, 64], sizes = [128, 32], strides = [1, 1]} : vector<128x96xf32> to vector<128x32xf32>
      %24 = arith.truncf %23 : vector<128x32xf32> to vector<128x32xbf16>
      %c0_18 = arith.constant 0 : index
      %c0_19 = arith.constant 0 : index
      %25 = vector.load %arg7[%c0_18, %c0_19] : memref<128x32xbf16, #tpu.memory_space<vmem>>, vector<128x32xbf16>
      tpu.vector_store %arg7[%c0_18, %c0_19], %24 {strides = array<i32>} : memref<128x32xbf16, #tpu.memory_space<vmem>>, vector<128x32xbf16>,
    } else {
    }
    return
  }
  func.func @transform_0(%arg0: i32, %arg1: i32) -> (i32, i32) {
    %c0_i32 = arith.constant 0 : i32
    return %arg0, %arg1 : i32, i32
  }
  func.func @transform_1(%arg0: i32, %arg1: i32) -> (i32, i32) {
    %c0_i32 = arith.constant 0 : i32
    %c0_i32_0 = arith.constant 0 : i32
    return %arg1, %c0_i32 : i32, i32
  }
  func.func @transform_2(%arg0: i32, %arg1: i32) -> (i32, i32) {
    %c0_i32 = arith.constant 0 : i32
    %c0_i32_0 = arith.constant 0 : i32
    %c0_i32_1 = arith.constant 0 : i32
    return %c0_i32, %c0_i32_0 : i32, i32
  }
  func.func @transform_3(%arg0: i32, %arg1: i32) -> (i32, i32) {
    %c0_i32 = arith.constant 0 : i32
    %c0_i32_0 = arith.constant 0 : i32
    return %arg0, %c0_i32 : i32, i32
  }
  func.func @transform_4(%arg0: i32, %arg1: i32) -> (i32, i32) {
    %c0_i32 = arith.constant 0 : i32
    %c0_i32_0 = arith.constant 0 : i32
    return %arg0, %c0_i32 : i32, i32
  }
  func.func @transform_5(%arg0: i32, %arg1: i32) -> (i32, i32) {
    %c0_i32 = arith.constant 0 : i32
    %c0_i32_0 = arith.constant 0 : i32
    return %arg0, %c0_i32 : i32, i32
  }
}

</mosaic_0001>

<bundles_post_ra>
// kernel: tpu_custom_call.1
= control target key start
LH: loop header
LB: loop body
LE: loop exit
PB: predicated region body
PF: predicated region fallthrough
CT: control target
= control target key end

     0   :  { %vm22_vm0 = vcmask 785408   ;;  %v595_v1 = vmov 0.0   ;;  %vm95_vm1 = vcmask 261120   ;;  %vm356_vm2 = vcmask 257024   ;;  %s597_s11 = smov 64   ;;  %s967_s1 = inlined_call_operand.vmem [shape: bf16[32,96], index: 1, kind: input, shape index: {}]   ;;  %s968_s0 = inlined_call_operand.vmem [shape: f32[128,32], index: 0, kind: input, shape index: {}]   ;;  %s969_s2 = inlined_call_operand.vmem [shape: f32[1,96], index: 2, kind: input, shape index: {}]   ;;  %s970_s3 = inlined_call_operand.vmem [shape: bf16[128,32], index: 3, kind: output, shape index: {0}]   ;;  %s971_s4 = inlined_call_operand.vmem [shape: bf16[128,32], index: 4, kind: output, shape index: {1}]   ;;  %s972_s5 = inlined_call_operand.vmem [shape: bf16[128,32], index: 5, kind: output, shape index: {2}]  }
   0x1   :  { %v593_v0 = vld [vmem:[%s967_s1 + $0x8] sm:$0xff]   ;;  %25 = vst.msk [vmem:[#allocation2 + $0x10] sm:$0xff] %vm22_vm0, %v595_v1  ;;  %23 = vst.msk [vmem:[#allocation2] sm:$0xff] %vm22_vm0, %v595_v1  ;;  %v594_v2 = vld [vmem:[%s967_s1] sm:$0xff]  }
   0x2   :  { %24 = vst.msk [vmem:[#allocation2 + $0x8] sm:$0xff] %vm22_vm0, %v595_v1  ;;  %26 = vst.msk [vmem:[#allocation2 + $0x18] sm:$0xff] %vm22_vm0, %v595_v1  ;;  %566 = vmatprep.subr.bf16.mxu0 %v593_v0  ;;  %586 = vmatprep.subr.bf16.mxu1 %v593_v0  ;;  %v39_v3 = vld [vmem:[%s968_s0] sm:$0xff]  ;;  %v40_v4 = vld [vmem:[%s968_s0 + $0x8] sm:$0xff] }
   0x3   :  { %27 = vst.msk [vmem:[#allocation2 + $0x20] sm:$0xff] %vm22_vm0, %v595_v1  ;;  %28 = vst.msk [vmem:[#allocation2 + $0x28] sm:$0xff] %vm22_vm0, %v595_v1  ;;  %v47_v5 = vld [vmem:[%s968_s0 + $0x40] sm:$0xff]  ;;  %567 = vmatpush3.bf16.msra.mxu0 %v593_v0  ;;  %588 = vmatpush3.bf16.msra.mxu1 %v593_v0  ;;  %v55_v6 = vpack.c.bf16 %v40_v4, %v39_v3  ;;  %v48_v7 = vld [vmem:[%s968_s0 + $0x48] sm:$0xff] }
   0x4   :  { %29 = vst.msk [vmem:[#allocation2 + $0x30] sm:$0xff] %vm22_vm0, %v595_v1  ;;  %30 = vst.msk [vmem:[#allocation2 + $0x38] sm:$0xff] %vm22_vm0, %v595_v1  ;;  %v41_v8 = vld [vmem:[%s968_s0 + $0x10] sm:$0xff]  ;;  %v42_v9 = vld [vmem:[%s968_s0 + $0x18] sm:$0xff]  ;;  %568 = vmatprep.subr.bf16.mxu0 %v594_v2  ;;  %587 = vmatprep.subr.bf16.mxu1 %v594_v2  ;;  %v59_v10 = vpack.c.bf16 %v48_v7, %v47_v5 }
   0x5   :  { %31 = vst.msk [vmem:[#allocation2 + $0x40] sm:$0xff] %vm22_vm0, %v595_v1  ;;  %32 = vst.msk [vmem:[#allocation2 + $0x48] sm:$0xff] %vm22_vm0, %v595_v1  ;;  %v49_v11 = vld [vmem:[%s968_s0 + $0x50] sm:$0xff]  ;;  %v50_v12 = vld [vmem:[%s968_s0 + $0x58] sm:$0xff]  ;;  %570 = vmatprep.mubr.msk.bf16.mxu0 %vm95_vm1, %v55_v6  ;;  %v56_v15 = vpack.c.bf16 %v42_v9, %v41_v8 }
   0x6   :  { %33 = vst.msk [vmem:[#allocation2 + $0x50] sm:$0xff] %vm22_vm0, %v595_v1  ;;  %34 = vst.msk [vmem:[#allocation2 + $0x58] sm:$0xff] %vm22_vm0, %v595_v1  ;;  %v43_v13 = vld [vmem:[%s968_s0 + $0x20] sm:$0xff]  ;;  %v44_v14 = vld [vmem:[%s968_s0 + $0x28] sm:$0xff]  ;;  %578 = vmatprep.mubr.msk.bf16.mxu1 %vm95_vm1, %v59_v10  ;;  %v60_v16 = vpack.c.bf16 %v50_v12, %v49_v11 }
   0x7   :  { %35 = vst.msk [vmem:[#allocation2 + $0x60] sm:$0xff] %vm22_vm0, %v595_v1  ;;  %36 = vst.msk [vmem:[#allocation2 + $0x68] sm:$0xff] %vm22_vm0, %v595_v1  ;;  %v51_v17 = vld [vmem:[%s968_s0 + $0x60] sm:$0xff]  ;;  %v52_v18 = vld [vmem:[%s968_s0 + $0x68] sm:$0xff]  ;;  %569 = vmatpush3.bf16.msra.mxu0 %v594_v2  ;;  %589 = vmatpush3.bf16.msra.mxu1 %v594_v2  ;;  %v57_v19 = vpack.c.bf16 %v44_v14, %v43_v13 }
   0x8   :  { %37 = vst.msk [vmem:[#allocation2 + $0x70] sm:$0xff] %vm22_vm0, %v595_v1  ;;  %38 = vst.msk [vmem:[#allocation2 + $0x78] sm:$0xff] %vm22_vm0, %v595_v1  ;;  %v61_v20 = vpack.c.bf16 %v52_v18, %v51_v17  ;;  %v45_v21 = vld [vmem:[%s968_s0 + $0x30] sm:$0xff]  ;;  %v46_v22 = vld [vmem:[%s968_s0 + $0x38] sm:$0xff] }
   0x9   :  { %v53_v23 = vld [vmem:[%s968_s0 + $0x70] sm:$0xff]  ;;  %v54_v24 = vld [vmem:[%s968_s0 + $0x78] sm:$0xff]  ;;  %v58_v25 = vpack.c.bf16 %v46_v22, %v45_v21  ;;  %v63_v31 = vld [vmem:[#allocation2] sm:$0xff] }
   0xa   :  { %571 = vmatmul.mubr.msk.bf16.vlgmr.msra.gmra.mxu0 %vm95_vm1, %v56_v15  ;;  %579 = vmatmul.mubr.msk.bf16.vlgmr.msra.gmra.mxu1 %vm95_vm1, %v60_v16  ;;  %v62_v26 = vpack.c.bf16 %v54_v24, %v53_v23  ;;  %v65_v27 = vld [vmem:[#allocation2 + $0x10] sm:$0xff]  ;;  %v66_v37 = vld [vmem:[#allocation2 + $0x18] sm:$0xff]  ;;  %v64_v43 = vld [vmem:[#allocation2 + $0x8] sm:$0xff] }
   0xb   :  { %574 = vmatprep.mubr.msk.bf16.mxu0 %vm95_vm1, %v57_v19  ;;  %582 = vmatprep.mubr.msk.bf16.mxu1 %vm95_vm1, %v61_v20  ;;  %v69_v49 = vld [vmem:[#allocation2 + $0x30] sm:$0xff]  ;;  %v715_v53 = vld [vmem:[%s969_s2] ss:$0 sm:$0xff]  ;;  %v70_v63 = vld [vmem:[#allocation2 + $0x38] sm:$0xff]  ;;  %s596_s2 = smov 96  }
   0xc   :  { %v71_v32 = vld [vmem:[#allocation2 + $0x40] sm:$0xff]  ;;  %v72_v44 = vld [vmem:[#allocation2 + $0x48] sm:$0xff] }
   0xd   :  { %v73_v28 = vld [vmem:[#allocation2 + $0x50] sm:$0xff]  ;;  %v74_v38 = vld [vmem:[#allocation2 + $0x58] sm:$0xff]  ;;  %v67_v55 = vld [vmem:[#allocation2 + $0x20] sm:$0xff] }
   0xe   :  { %v75_v57 = vld [vmem:[#allocation2 + $0x60] sm:$0xff]  ;;  %v68_v14 = vld [vmem:[#allocation2 + $0x28] sm:$0xff] }
   0xf   :  { %v77_v50 = vld [vmem:[#allocation2 + $0x70] sm:$0xff]  ;;  %v78_v5 = vld [vmem:[#allocation2 + $0x78] sm:$0xff]  ;;  %v76_v15 = vld [vmem:[#allocation2 + $0x68] sm:$0xff] }
  0x12   :  { %575 = vmatmul.mubr.msk.bf16.gmra.mxu0 %vm95_vm1, %v58_v25  ;;  %583 = vmatmul.mubr.msk.bf16.gmra.mxu1 %vm95_vm1, %v62_v26 }
  0xca   :  { %v572_v29 = vpop.f32.mrf.mxu0  ;;  %v580_v30 = vpop.f32.mrf.mxu1 }
  0xcb   :  { %v219_v33 = vadd.f32 %v572_v29, %v65_v27  ;;  %v227_v34 = vadd.f32 %v580_v30, %v73_v28 }
  0xcc   :  { %v154_v35 = vpop.f32.mrf.mxu0  ;;  %v186_v36 = vpop.f32.mrf.mxu1 }
  0xcd   :  { %236 = vst.msk [vmem:[#allocation2 + $0x10] sm:$0xff] %vm22_vm0, %v219_v33  ;;  %244 = vst.msk [vmem:[#allocation2 + $0x50] sm:$0xff] %vm22_vm0, %v227_v34  ;;  %v217_v39 = vadd.f32 %v154_v35, %v63_v31  ;;  %v225_v40 = vadd.f32 %v186_v36, %v71_v32 }
  0xce   :  { %v573_v41 = vpop.f32.mrf.mxu0  ;;  %v581_v42 = vpop.f32.mrf.mxu1 }
  0xcf   :  { %234 = vst.msk [vmem:[#allocation2] sm:$0xff] %vm22_vm0, %v217_v39  ;;  %242 = vst.msk [vmem:[#allocation2 + $0x40] sm:$0xff] %vm22_vm0, %v225_v40  ;;  %v220_v45 = vadd.f32 %v573_v41, %v66_v37  ;;  %v228_v46 = vadd.f32 %v581_v42, %v74_v38 }
  0xd0   :  { %v157_v47 = vpop.f32.mrf.mxu0  ;;  %v189_v48 = vpop.f32.mrf.mxu1 }
  0xd1   :  { %237 = vst.msk [vmem:[#allocation2 + $0x18] sm:$0xff] %vm22_vm0, %v220_v45  ;;  %245 = vst.msk [vmem:[#allocation2 + $0x58] sm:$0xff] %vm22_vm0, %v228_v46  ;;  %v218_v51 = vadd.f32 %v157_v47, %v64_v43  ;;  %v226_v52 = vadd.f32 %v189_v48, %v72_v44 }
  0xd2   :  { %v576_v54 = vpop.f32.mrf.mxu0  ;;  %v584_v56 = vpop.f32.mrf.mxu1 }
  0xd3   :  { %235 = vst.msk [vmem:[#allocation2 + $0x8] sm:$0xff] %vm22_vm0, %v218_v51  ;;  %243 = vst.msk [vmem:[#allocation2 + $0x48] sm:$0xff] %vm22_vm0, %v226_v52  ;;  %v223_v58 = vadd.f32 %v576_v54, %v69_v49  ;;  %v231_v59 = vadd.f32 %v584_v56, %v77_v50 }
  0xd4   :  { %v263_v60 = vld [vmem:[#allocation2 + $0x50] sm:$0xff]  ;;  %v170_v62 = vpop.f32.mrf.mxu0  ;;  %v202_v0 = vpop.f32.mrf.mxu1 }
  0xd5   :  { %v255_v61 = vld [vmem:[#allocation2 + $0x10] sm:$0xff]  ;;  %v286_v1 = vadd.f32 %v715_v53, %v263_v60  ;;  %240 = vst.msk [vmem:[#allocation2 + $0x30] sm:$0xff] %vm22_vm0, %v223_v58  ;;  %v221_v3 = vadd.f32 %v170_v62, %v67_v55  ;;  %248 = vst.msk [vmem:[#allocation2 + $0x70] sm:$0xff] %vm22_vm0, %v231_v59  ;;  %v229_v4 = vadd.f32 %v202_v0, %v75_v57 }
  0xd6   :  { %v278_v2 = vadd.f32 %v715_v53, %v255_v61  ;;  %v577_v6 = vpop.f32.mrf.mxu0  ;;  %v253_v7 = vld [vmem:[#allocation2] sm:$0xff]  ;;  %v585_v8 = vpop.f32.mrf.mxu1 }
  0xd7   :  { %v261_v9 = vld [vmem:[#allocation2 + $0x40] sm:$0xff]  ;;  %v550_v10 = vpack.c.bf16 %v286_v1, %v286_v1  ;;  %238 = vst.msk [vmem:[#allocation2 + $0x20] sm:$0xff] %vm22_vm0, %v221_v3  ;;  %v224_v12 = vadd.f32 %v577_v6, %v70_v63  ;;  %v276_v13 = vadd.f32 %v715_v53, %v253_v7  ;;  %246 = vst.msk [vmem:[#allocation2 + $0x60] sm:$0xff] %vm22_vm0, %v229_v4 }
  0xd8   :  { %v542_v11 = vpack.c.bf16 %v278_v2, %v278_v2  ;;  %v256_v16 = vld [vmem:[#allocation2 + $0x18] sm:$0xff]  ;;  %v173_v18 = vpop.f32.mrf.mxu0  ;;  %v232_v19 = vadd.f32 %v585_v8, %v78_v5  ;;  %v284_v20 = vadd.f32 %v715_v53, %v261_v9  ;;  %v205_v21 = vpop.f32.mrf.mxu1 }
  0xd9   :  { %v264_v17 = vld [vmem:[#allocation2 + $0x58] sm:$0xff]  ;;  %393 = vrot.lane.b32.xlu0 %v550_v10, %s596_s2  ;;  %367 = vst.msk [vmem:[%s970_s3 + $0x28] sm:$0xf] %vm356_vm2, %v550_v10  ;;  %v279_v22 = vadd.f32 %v715_v53, %v256_v16  ;;  %v540_v24 = vpack.c.bf16 %v276_v13, %v276_v13  ;;  %v222_v25 = vadd.f32 %v173_v18, %v68_v14 }
  0xda   :  { %377 = vrot.lane.b32.xlu1 %v542_v11, %s596_s2  ;;  %359 = vst.msk [vmem:[%s970_s3 + $0x8] sm:$0xf] %vm356_vm2, %v542_v11  ;;  %v287_v23 = vadd.f32 %v715_v53, %v264_v17  ;;  %v548_v26 = vpack.c.bf16 %v284_v20, %v284_v20  ;;  %v230_v27 = vadd.f32 %v205_v21, %v76_v15  ;;  %v262_v28 = vld [vmem:[#allocation2 + $0x48] sm:$0xff] }
  0xdb   :  { %241 = vst.msk [vmem:[#allocation2 + $0x38] sm:$0xff] %vm22_vm0, %v224_v12  ;;  %249 = vst.msk [vmem:[#allocation2 + $0x78] sm:$0xff] %vm22_vm0, %v232_v19  ;;  %v254_v29 = vld [vmem:[#allocation2 + $0x8] sm:$0xff]  ;;  %v543_v30 = vpack.c.bf16 %v279_v22, %v279_v22  ;;  %v285_v32 = vadd.f32 %v715_v53, %v262_v28 }
  0xdc   :  { %v551_v31 = vpack.c.bf16 %v287_v23, %v287_v23  ;;  %357 = vst.msk [vmem:[%s970_s3] sm:$0xf] %vm356_vm2, %v540_v24  ;;  %v277_v33 = vadd.f32 %v715_v53, %v254_v29  ;;  %365 = vst.msk [vmem:[%s970_s3 + $0x20] sm:$0xf] %vm356_vm2, %v548_v26  ;;  %v259_v34 = vld [vmem:[#allocation2 + $0x30] sm:$0xff] }
  0xdd   :  { %239 = vst.msk [vmem:[#allocation2 + $0x28] sm:$0xff] %vm22_vm0, %v222_v25  ;;  %247 = vst.msk [vmem:[#allocation2 + $0x68] sm:$0xff] %vm22_vm0, %v230_v27  ;;  %v267_v35 = vld [vmem:[#allocation2 + $0x70] sm:$0xff]  ;;  %441 = vrot.lane.b32.xlu0 %v542_v11, %s597_s11  ;;  %v549_v36 = vpack.c.bf16 %v285_v32, %v285_v32  ;;  %v282_v38 = vadd.f32 %v715_v53, %v259_v34 }
  0xde   :  { %379 = vrot.lane.b32.xlu1 %v543_v30, %s596_s2  ;;  %360 = vst.msk [vmem:[%s970_s3 + $0xc] sm:$0xf] %vm356_vm2, %v543_v30  ;;  %368 = vst.msk [vmem:[%s970_s3 + $0x2c] sm:$0xf] %vm356_vm2, %v551_v31  ;;  %v541_v37 = vpack.c.bf16 %v277_v33, %v277_v33  ;;  %v290_v39 = vadd.f32 %v715_v53, %v267_v35  ;;  %v257_v40 = vld [vmem:[#allocation2 + $0x20] sm:$0xff] }
  0xdf   :  { %v265_v41 = vld [vmem:[#allocation2 + $0x60] sm:$0xff]  ;;  %366 = vst.msk [vmem:[%s970_s3 + $0x24] sm:$0xf] %vm356_vm2, %v549_v36  ;;  %v546_v42 = vpack.c.bf16 %v282_v38, %v282_v38  ;;  %v280_v43 = vadd.f32 %v715_v53, %v257_v40 }
  0xe0   :  { %358 = vst.msk [vmem:[%s970_s3 + $0x4] sm:$0xf] %vm356_vm2, %v541_v37  ;;  %v288_v44 = vadd.f32 %v715_v53, %v265_v41  ;;  %v554_v46 = vpack.c.bf16 %v290_v39, %v290_v39 }
  0xe1   :  { %457 = vrot.lane.b32.xlu0 %v550_v10, %s597_s11  ;;  %363 = vst.msk [vmem:[%s970_s3 + $0x18] sm:$0xf] %vm356_vm2, %v546_v42  ;;  %v544_v49 = vpack.c.bf16 %v280_v43, %v280_v43 }
  0xe2   :  { %v260_v45 = vld [vmem:[#allocation2 + $0x38] sm:$0xff]  ;;  %395 = vrot.lane.b32.xlu1 %v551_v31, %s596_s2  ;;  %v552_v50 = vpack.c.bf16 %v288_v44, %v288_v44  ;;  %371 = vst.msk [vmem:[%s970_s3 + $0x38] sm:$0xf] %vm356_vm2, %v554_v46 }
  0xe3   :  { %v283_v47 = vadd.f32 %v715_v53, %v260_v45  ;;  %v268_v48 = vld [vmem:[#allocation2 + $0x78] sm:$0xff]  ;;  %361 = vst.msk [vmem:[%s970_s3 + $0x10] sm:$0xf] %vm356_vm2, %v544_v49 }
  0xe4   :  { %v291_v51 = vadd.f32 %v715_v53, %v268_v48  ;;  %v258_v54 = vld [vmem:[#allocation2 + $0x28] sm:$0xff]  ;;  %369 = vst.msk [vmem:[%s970_s3 + $0x30] sm:$0xf] %vm356_vm2, %v552_v50 }
  0xe5   :  { %v547_v52 = vpack.c.bf16 %v283_v47, %v283_v47  ;;  %v266_v55 = vld [vmem:[#allocation2 + $0x68] sm:$0xff]  ;;  %v281_v57 = vadd.f32 %v715_v53, %v258_v54  ;;  %373 = vrot.lane.b32.xlu0 %v540_v24, %s596_s2 }
  0xe6   :  { %v555_v56 = vpack.c.bf16 %v291_v51, %v291_v51  ;;  %v289_v58 = vadd.f32 %v715_v53, %v266_v55  ;;  %443 = vrot.lane.b32.xlu1 %v543_v30, %s597_s11 }
  0xe7   :  { %364 = vst.msk [vmem:[%s970_s3 + $0x1c] sm:$0xf] %vm356_vm2, %v547_v52  ;;  %v545_v59 = vpack.c.bf16 %v281_v57, %v281_v57 }
  0xe8   :  { %372 = vst.msk [vmem:[%s970_s3 + $0x3c] sm:$0xf] %vm356_vm2, %v555_v56  ;;  %v553_v60 = vpack.c.bf16 %v289_v58, %v289_v58 }
  0xe9   :  { %362 = vst.msk [vmem:[%s970_s3 + $0x14] sm:$0xf] %vm356_vm2, %v545_v59  ;;  %389 = vrot.lane.b32.xlu0 %v548_v26, %s596_s2 }
  0xea   :  { %370 = vst.msk [vmem:[%s970_s3 + $0x34] sm:$0xf] %vm356_vm2, %v553_v60  ;;  %459 = vrot.lane.b32.xlu1 %v551_v31, %s597_s11 }
  0xed   :  { %437 = vrot.lane.b32.xlu0 %v540_v24, %s597_s11 }
  0xee   :  { %391 = vrot.lane.b32.xlu1 %v549_v36, %s596_s2 }
  0xf1   :  { %453 = vrot.lane.b32.xlu0 %v548_v26, %s597_s11 }
  0xf2   :  { %439 = vrot.lane.b32.xlu1 %v541_v37, %s597_s11 }
  0xf5   :  { %375 = vrot.lane.b32.xlu0 %v541_v37, %s596_s2 }
  0xf6   :  { %455 = vrot.lane.b32.xlu1 %v549_v36, %s597_s11 }
  0xf9   :  { %385 = vrot.lane.b32.xlu0 %v546_v42, %s596_s2 }
  0xfa   :  { %387 = vrot.lane.b32.xlu1 %v547_v52, %s596_s2 }
  0xfd   :  { %401 = vrot.lane.b32.xlu0 %v554_v46, %s596_s2 }
  0xfe   :  { %403 = vrot.lane.b32.xlu1 %v555_v56, %s596_s2 }
 0x101   :  { %449 = vrot.lane.b32.xlu0 %v546_v42, %s597_s11 }
 0x102   :  { %451 = vrot.lane.b32.xlu1 %v547_v52, %s597_s11 }
 0x105   :  { %381 = vrot.lane.b32.xlu0 %v544_v49, %s596_s2 }
 0x106   :  { %383 = vrot.lane.b32.xlu1 %v545_v59, %s596_s2 }
 0x109   :  { %397 = vrot.lane.b32.xlu0 %v552_v50, %s596_s2 }
 0x10a   :  { %399 = vrot.lane.b32.xlu1 %v553_v60, %s596_s2 }
 0x10d   :  { %445 = vrot.lane.b32.xlu0 %v544_v49, %s597_s11 }
 0x10e   :  { %447 = vrot.lane.b32.xlu1 %v545_v59, %s597_s11 }
 0x111   :  { %461 = vrot.lane.b32.xlu0 %v552_v50, %s597_s11 }
 0x112   :  { %463 = vrot.lane.b32.xlu1 %v553_v60, %s597_s11 }
 0x115   :  { %465 = vrot.lane.b32.xlu0 %v554_v46, %s597_s11 }
 0x116   :  { %467 = vrot.lane.b32.xlu1 %v555_v56, %s597_s11 }
 0x14b   :  { %v394_v53 = vpop.permute.xlu0 %393 }
 0x14c   :  { %v378_v61 = vpop.permute.xlu1 %377  ;;  %431 = vst.msk [vmem:[%s971_s4 + $0x28] sm:$0xf] %vm356_vm2, %v394_v53 }
 0x14d   :  { %423 = vst.msk [vmem:[%s971_s4 + $0x8] sm:$0xf] %vm356_vm2, %v378_v61 }
 0x14f   :  { %v442_v62 = vpop.permute.xlu0 %441 }
 0x150   :  { %v380_v63 = vpop.permute.xlu1 %379  ;;  %487 = vst.msk [vmem:[%s972_s5 + $0x8] sm:$0xf] %vm356_vm2, %v442_v62 }
 0x151   :  { %424 = vst.msk [vmem:[%s971_s4 + $0xc] sm:$0xf] %vm356_vm2, %v380_v63 }
 0x153   :  { %v458_v0 = vpop.permute.xlu0 %457 }
 0x154   :  { %v396_v1 = vpop.permute.xlu1 %395  ;;  %495 = vst.msk [vmem:[%s972_s5 + $0x28] sm:$0xf] %vm356_vm2, %v458_v0 }
 0x155   :  { %432 = vst.msk [vmem:[%s971_s4 + $0x2c] sm:$0xf] %vm356_vm2, %v396_v1 }
 0x157   :  { %v374_v2 = vpop.permute.xlu0 %373 }
 0x158   :  { %v444_v3 = vpop.permute.xlu1 %443  ;;  %421 = vst.msk [vmem:[%s971_s4] sm:$0xf] %vm356_vm2, %v374_v2 }
 0x159   :  { %488 = vst.msk [vmem:[%s972_s5 + $0xc] sm:$0xf] %vm356_vm2, %v444_v3 }
 0x15b   :  { %v390_v4 = vpop.permute.xlu0 %389 }
 0x15c   :  { %v460_v5 = vpop.permute.xlu1 %459  ;;  %429 = vst.msk [vmem:[%s971_s4 + $0x20] sm:$0xf] %vm356_vm2, %v390_v4 }
 0x15d   :  { %496 = vst.msk [vmem:[%s972_s5 + $0x2c] sm:$0xf] %vm356_vm2, %v460_v5 }
 0x15f   :  { %v438_v6 = vpop.permute.xlu0 %437 }
 0x160   :  { %v392_v7 = vpop.permute.xlu1 %391  ;;  %485 = vst.msk [vmem:[%s972_s5] sm:$0xf] %vm356_vm2, %v438_v6 }
 0x161   :  { %430 = vst.msk [vmem:[%s971_s4 + $0x24] sm:$0xf] %vm356_vm2, %v392_v7 }
 0x163   :  { %v454_v8 = vpop.permute.xlu0 %453 }
 0x164   :  { %v440_v9 = vpop.permute.xlu1 %439  ;;  %493 = vst.msk [vmem:[%s972_s5 + $0x20] sm:$0xf] %vm356_vm2, %v454_v8 }
 0x165   :  { %486 = vst.msk [vmem:[%s972_s5 + $0x4] sm:$0xf] %vm356_vm2, %v440_v9 }
 0x167   :  { %v376_v11 = vpop.permute.xlu0 %375 }
 0x168   :  { %v456_v10 = vpop.permute.xlu1 %455  ;;  %422 = vst.msk [vmem:[%s971_s4 + $0x4] sm:$0xf] %vm356_vm2, %v376_v11 }
 0x169   :  { %494 = vst.msk [vmem:[%s972_s5 + $0x24] sm:$0xf] %vm356_vm2, %v456_v10 }
 0x16b   :  { %v386_v12 = vpop.permute.xlu0 %385 }
 0x16c   :  { %v388_v13 = vpop.permute.xlu1 %387  ;;  %427 = vst.msk [vmem:[%s971_s4 + $0x18] sm:$0xf] %vm356_vm2, %v386_v12 }
 0x16d   :  { %428 = vst.msk [vmem:[%s971_s4 + $0x1c] sm:$0xf] %vm356_vm2, %v388_v13 }
 0x16f   :  { %v402_v14 = vpop.permute.xlu0 %401 }
 0x170   :  { %v404_v15 = vpop.permute.xlu1 %403  ;;  %435 = vst.msk [vmem:[%s971_s4 + $0x38] sm:$0xf] %vm356_vm2, %v402_v14 }
 0x171   :  { %436 = vst.msk [vmem:[%s971_s4 + $0x3c] sm:$0xf] %vm356_vm2, %v404_v15 }
 0x173   :  { %v450_v16 = vpop.permute.xlu0 %449 }
 0x174   :  { %v452_v17 = vpop.permute.xlu1 %451  ;;  %491 = vst.msk [vmem:[%s972_s5 + $0x18] sm:$0xf] %vm356_vm2, %v450_v16 }
 0x175   :  { %492 = vst.msk [vmem:[%s972_s5 + $0x1c] sm:$0xf] %vm356_vm2, %v452_v17 }
 0x177   :  { %v382_v18 = vpop.permute.xlu0 %381 }
 0x178   :  { %v384_v19 = vpop.permute.xlu1 %383  ;;  %425 = vst.msk [vmem:[%s971_s4 + $0x10] sm:$0xf] %vm356_vm2, %v382_v18 }
 0x179   :  { %426 = vst.msk [vmem:[%s971_s4 + $0x14] sm:$0xf] %vm356_vm2, %v384_v19 }
 0x17b   :  { %v398_v20 = vpop.permute.xlu0 %397 }
 0x17c   :  { %v400_v21 = vpop.permute.xlu1 %399  ;;  %433 = vst.msk [vmem:[%s971_s4 + $0x30] sm:$0xf] %vm356_vm2, %v398_v20 }
 0x17d   :  { %434 = vst.msk [vmem:[%s971_s4 + $0x34] sm:$0xf] %vm356_vm2, %v400_v21 }
 0x17f   :  { %v446_v22 = vpop.permute.xlu0 %445 }
 0x180   :  { %v448_v23 = vpop.permute.xlu1 %447  ;;  %489 = vst.msk [vmem:[%s972_s5 + $0x10] sm:$0xf] %vm356_vm2, %v446_v22 }
 0x181   :  { %490 = vst.msk [vmem:[%s972_s5 + $0x14] sm:$0xf] %vm356_vm2, %v448_v23 }
 0x183   :  { %v462_v24 = vpop.permute.xlu0 %461 }
 0x184   :  { %v464_v25 = vpop.permute.xlu1 %463  ;;  %497 = vst.msk [vmem:[%s972_s5 + $0x30] sm:$0xf] %vm356_vm2, %v462_v24 }
 0x185   :  { %498 = vst.msk [vmem:[%s972_s5 + $0x34] sm:$0xf] %vm356_vm2, %v464_v25 }
 0x187   :  { %v466_v26 = vpop.permute.xlu0 %465 }
 0x188   :  { %v468_v27 = vpop.permute.xlu1 %467  ;;  %499 = vst.msk [vmem:[%s972_s5 + $0x38] sm:$0xf] %vm356_vm2, %v466_v26 }
 0x189   :  { %500 = vst.msk [vmem:[%s972_s5 + $0x3c] sm:$0xf] %vm356_vm2, %v468_v27 }

</bundles_post_ra>
